<compile_context>
chip_gen: v7x
topology: tpu7x:2x2x1
jax: 0.10.0
libtpu: 0.0.40
codegen_flags: <defaults>
</compile_context>

<pallas_src>
import jax
import jax.numpy as jnp
from jax.experimental import pallas as pl
from jax.experimental.pallas import tpu as pltpu

DIM_INPUT = 128      # toy stand-in for 1280
DIM_HIDDEN = 256     # toy stand-in for 2560
DROPOUT_P = 0.5
BATCH = 16
TILE_B = BATCH       # whole batch per invocation at toy size -> grid=(1,)


def net_kernel(x_ref, noise_ref, mask_ref,
               we_ref, be_ref, wd_ref, bd_ref, wo_ref, bo_ref,
               logits_ref, rec_ref):
    tb = x_ref.shape[0]                              # static block size
    x = x_ref[...]

    # encoder input #1: X + randn_like(X) * 0.1
    x_noisy = x + noise_ref[...] * 0.1
    # encoder input #2: inverted dropout, p = 0.5 (module default training=True)
    x_drop = x * mask_ref[...] * (1.0 / (1.0 - DROPOUT_P))

    # One stacked MXU matmul against We for both encoder inputs.
    # bf16 operands, f32 accumulation; bias + ReLU in f32.
    stacked = jnp.concatenate([x_noisy, x_drop], axis=0).astype(jnp.bfloat16)
    h = jnp.dot(stacked, we_ref[...], preferred_element_type=jnp.float32)
    h = jnp.maximum(h + be_ref[...], 0.0)            # (2*tb, Dh) f32

    hidden_noise = h[:tb, :]                         # static sublane-aligned slices
    hidden = h[tb:, :]

    # decoder(hidden_noise) = ReLU(hidden_noise @ Wd + bd)   (bf16 MXU, f32 acc)
    rec_ref[...] = jnp.maximum(
        jnp.dot(hidden_noise.astype(jnp.bfloat16), wd_ref[...],
                preferred_element_type=jnp.float32) + bd_ref[...], 0.0)

    # output(hidden): degenerate N=1 matmul replaced by VPU multiply + lane
    # reduction (runs on VPU/XLU slots, frees the MXU, no 1-lane MXU drain).
    wo_row = wo_ref[...]                             # (1, Dh) f32
    logits_ref[...] = (jnp.sum(hidden * wo_row, axis=-1, keepdims=True)
                       + bo_ref[0, 0])


def net_forward(x, noise, keep_mask, we, be, wd, bd, wo, bo):
    B, Din = x.shape
    Dh = we.shape[1]
    assert B % TILE_B == 0
    grid = (B // TILE_B,)

    # bf16 weights for the two big matmuls; biases / Wo stay f32 (tiny).
    we_b = we.astype(jnp.bfloat16)
    wd_b = wd.astype(jnp.bfloat16)
    wo_row = wo.reshape(1, Dh)       # lane-dense row layout for the VPU reduction

    # TODO(synk): at full scale (Din=1280, Dh=2560) on v7x, single-buffer the
    # resident weights (pipeline_mode=pl.Buffered(1)) or tile Dh as an
    # "arbitrary" reduction axis so peak VMEM stays under 64 MiB; unnecessary
    # at these toy sizes.
    logits, rec = pl.pallas_call(
        net_kernel,
        out_shape=(
            jax.ShapeDtypeStruct((B, 1), jnp.float32),
            jax.ShapeDtypeStruct((B, Din), jnp.float32),
        ),
        grid_spec=pltpu.PrefetchScalarGridSpec(
            num_scalar_prefetch=0,
            grid=grid,
            in_specs=[
                pl.BlockSpec((TILE_B, Din), lambda i: (i, 0)),   # X tile
                pl.BlockSpec((TILE_B, Din), lambda i: (i, 0)),   # noise tile
                pl.BlockSpec((TILE_B, Din), lambda i: (i, 0)),   # dropout keep-mask
                pl.BlockSpec((Din, Dh), lambda i: (0, 0)),       # We (resident, bf16)
                pl.BlockSpec((1, Dh), lambda i: (0, 0)),         # be
                pl.BlockSpec((Dh, Din), lambda i: (0, 0)),       # Wd (resident, bf16)
                pl.BlockSpec((1, Din), lambda i: (0, 0)),        # bd
                pl.BlockSpec((1, Dh), lambda i: (0, 0)),         # Wo as (1, Dh) row
                pl.BlockSpec(memory_space=pltpu.MemorySpace.SMEM),  # bo scalar
            ],
            out_specs=[
                pl.BlockSpec((TILE_B, 1), lambda i: (i, 0)),     # logits tile
                pl.BlockSpec((TILE_B, Din), lambda i: (i, 0)),   # rec (lane-dense)
            ],
        ),
        compiler_params=pltpu.CompilerParams(
            dimension_semantics=("parallel",),
            vmem_limit_bytes=64 * 1024 * 1024),
    )(x, noise, keep_mask, we_b, be, wd_b, bd, wo_row, bo)

    return logits.reshape(-1), rec   # logits.view(-1)


def reference_forward(x, noise, keep_mask, we, be, wd, bd, wo, bo):
    # Plain-JAX reference replicating the kernel's mixed precision (bf16
    # operands, f32 accumulation) so the comparison is apples-to-apples.
    x_noisy = x + noise * 0.1
    x_drop = x * keep_mask * (1.0 / (1.0 - DROPOUT_P))
    we_b = we.astype(jnp.bfloat16)
    wd_b = wd.astype(jnp.bfloat16)
    hidden_noise = jnp.maximum(
        jnp.dot(x_noisy.astype(jnp.bfloat16), we_b,
                preferred_element_type=jnp.float32) + be, 0.0)
    hidden = jnp.maximum(
        jnp.dot(x_drop.astype(jnp.bfloat16), we_b,
                preferred_element_type=jnp.float32) + be, 0.0)
    rec = jnp.maximum(
        jnp.dot(hidden_noise.astype(jnp.bfloat16), wd_b,
                preferred_element_type=jnp.float32) + bd, 0.0)
    logits = jnp.sum(hidden * wo.reshape(1, -1), axis=-1) + bo.reshape(())
    return logits, rec


if __name__ == "__main__":
    key = jax.random.PRNGKey(0)
    k_x, k_n, k_m, k_we, k_be, k_wd, k_bd, k_wo, k_bo = jax.random.split(key, 9)

    x = jax.random.normal(k_x, (BATCH, DIM_INPUT), dtype=jnp.float32)
    noise = jax.random.normal(k_n, (BATCH, DIM_INPUT), dtype=jnp.float32)
    # dropout keep-mask, p=0.5, module default is training=True
    keep_mask = jax.random.bernoulli(
        k_m, p=1.0 - DROPOUT_P, shape=(BATCH, DIM_INPUT)).astype(jnp.float32)

    # Deterministic parameter init (uniform, PyTorch-Linear-style bound
    # 1/sqrt(fan_in)), stored pre-transposed as (in, out).
    def lin_init(kw, kb, fan_in, fan_out):
        bound = 1.0 / (fan_in ** 0.5)
        w = jax.random.uniform(kw, (fan_in, fan_out), jnp.float32, -bound, bound)
        b = jax.random.uniform(kb, (1, fan_out), jnp.float32, -bound, bound)
        return w, b

    we, be = lin_init(k_we, k_be, DIM_INPUT, DIM_HIDDEN)   # encoder Linear
    wd, bd = lin_init(k_wd, k_bd, DIM_HIDDEN, DIM_INPUT)   # decoder Linear
    wo, bo = lin_init(k_wo, k_bo, DIM_HIDDEN, 1)           # output Linear

    logits, rec = net_forward(x, noise, keep_mask, we, be, wd, bd, wo, bo)
    jax.block_until_ready((logits, rec))

    ref_logits, ref_rec = reference_forward(x, noise, keep_mask, we, be, wd, bd, wo, bo)
    assert logits.shape == (BATCH,)
    assert rec.shape == (BATCH, DIM_INPUT)
    assert jnp.allclose(logits, ref_logits, atol=5e-3, rtol=5e-3)
    assert jnp.allclose(rec, ref_rec, atol=5e-3, rtol=5e-3)

    print("KERNEL_OK")
</pallas_src>

<mosaic_0001>
module attributes {stable_mosaic.version = 11 : i64} {
  func.func @net_kernel(%arg0: i32, %arg1: memref<16x128xf32, #tpu.memory_space<vmem>>, %arg2: memref<16x128xf32, #tpu.memory_space<vmem>>, %arg3: memref<16x128xf32, #tpu.memory_space<vmem>>, %arg4: memref<128x256xbf16, #tpu.memory_space<vmem>>, %arg5: memref<1x256xf32, #tpu.memory_space<vmem>>, %arg6: memref<256x128xbf16, #tpu.memory_space<vmem>>, %arg7: memref<1x128xf32, #tpu.memory_space<vmem>>, %arg8: memref<1x256xf32, #tpu.memory_space<vmem>>, %arg9: memref<1x1xf32, #tpu.memory_space<smem>>, %arg10: memref<16x1xf32, #tpu.memory_space<vmem>>, %arg11: memref<16x128xf32, #tpu.memory_space<vmem>>) attributes {dimension_semantics = [#tpu.dimension_semantics<parallel>], iteration_bounds = array<i64: 1>, scalar_prefetch = 0 : i64, scratch_operands = 0 : i64, tpu.core_type = #tpu.core_type<tc>, window_params = [{transform_indices = @transform_0, window_bounds = array<i64: 16, 128>}, {transform_indices = @transform_1, window_bounds = array<i64: 16, 128>}, {transform_indices = @transform_2, window_bounds = array<i64: 16, 128>}, {pipeline_mode = #tpu.pipeline_mode<synchronous>, transform_indices = @transform_3, window_bounds = array<i64: 128, 256>}, {pipeline_mode = #tpu.pipeline_mode<synchronous>, transform_indices = @transform_4, window_bounds = array<i64: 1, 256>}, {pipeline_mode = #tpu.pipeline_mode<synchronous>, transform_indices = @transform_5, window_bounds = array<i64: 256, 128>}, {pipeline_mode = #tpu.pipeline_mode<synchronous>, transform_indices = @transform_6, window_bounds = array<i64: 1, 128>}, {pipeline_mode = #tpu.pipeline_mode<synchronous>, transform_indices = @transform_7, window_bounds = array<i64: 1, 256>}, {transform_indices = @transform_8, window_bounds = array<i64: 1, 1>}, {transform_indices = @transform_9, window_bounds = array<i64: 16, 1>}, {transform_indices = @transform_10, window_bounds = array<i64: 16, 128>}]} {
    %c0 = arith.constant 0 : index
    %c0_0 = arith.constant 0 : index
    %0 = vector.load %arg1[%c0, %c0_0] : memref<16x128xf32, #tpu.memory_space<vmem>>, vector<16x128xf32>
    %c0_1 = arith.constant 0 : index
    %c0_2 = arith.constant 0 : index
    %1 = vector.load %arg2[%c0_1, %c0_2] : memref<16x128xf32, #tpu.memory_space<vmem>>, vector<16x128xf32>
    %cst = arith.constant 1.000000e-01 : f32
    %2 = vector.broadcast %cst : f32 to vector<16x128xf32>
    %3 = arith.mulf %1, %2 : vector<16x128xf32>
    %4 = arith.addf %0, %3 : vector<16x128xf32>
    %c0_3 = arith.constant 0 : index
    %c0_4 = arith.constant 0 : index
    %5 = vector.load %arg3[%c0_3, %c0_4] : memref<16x128xf32, #tpu.memory_space<vmem>>, vector<16x128xf32>
    %6 = arith.mulf %0, %5 : vector<16x128xf32>
    %cst_5 = arith.constant 2.000000e+00 : f32
    %7 = vector.broadcast %cst_5 : f32 to vector<16x128xf32>
    %8 = arith.mulf %6, %7 : vector<16x128xf32>
    %9 = tpu.concatenate %4, %8 in 0 : vector<16x128xf32>, vector<16x128xf32> -> vector<32x128xf32>
    %10 = arith.truncf %9 : vector<32x128xf32> to vector<32x128xbf16>
    %c0_6 = arith.constant 0 : index
    %c0_7 = arith.constant 0 : index
    %11 = vector.load %arg4[%c0_6, %c0_7] : memref<128x256xbf16, #tpu.memory_space<vmem>>, vector<128x256xbf16>
    %cst_8 = arith.constant dense<0.000000e+00> : vector<32x256xf32>
    %12 = tpu.matmul %10, %11, %cst_8 {dimension_numbers = #tpu.dot_dimension_numbers<[1], [0], [0], [1], [0, 0, 1, 1], [], []>} : vector<32x128xbf16>, vector<128x256xbf16>, vector<32x256xf32> -> vector<32x256xf32>
    %c0_9 = arith.constant 0 : index
    %c0_10 = arith.constant 0 : index
    %13 = vector.load %arg5[%c0_9, %c0_10] : memref<1x256xf32, #tpu.memory_space<vmem>>, vector<1x256xf32>
    %14 = vector.broadcast %13 : vector<1x256xf32> to vector<32x256xf32>
    %15 = arith.addf %12, %14 : vector<32x256xf32>
    %cst_11 = arith.constant 0.000000e+00 : f32
    %16 = vector.broadcast %cst_11 : f32 to vector<32x256xf32>
    %17 = arith.maximumf %15, %16 : vector<32x256xf32>
    %18 = vector.extract_strided_slice %17 {offsets = [0, 0], sizes = [16, 256], strides = [1, 1]} : vector<32x256xf32> to vector<16x256xf32>
    %19 = vector.extract_strided_slice %17 {offsets = [16, 0], sizes = [16, 256], strides = [1, 1]} : vector<32x256xf32> to vector<16x256xf32>
    %20 = arith.truncf %18 : vector<16x256xf32> to vector<16x256xbf16>
    %c0_12 = arith.constant 0 : index
    %c0_13 = arith.constant 0 : index
    %21 = vector.load %arg6[%c0_12, %c0_13] : memref<256x128xbf16, #tpu.memory_space<vmem>>, vector<256x128xbf16>
    %cst_14 = arith.constant dense<0.000000e+00> : vector<16x128xf32>
    %22 = tpu.matmul %20, %21, %cst_14 {dimension_numbers = #tpu.dot_dimension_numbers<[1], [0], [0], [1], [0, 0, 1, 1], [], []>} : vector<16x256xbf16>, vector<256x128xbf16>, vector<16x128xf32> -> vector<16x128xf32>
    %c0_15 = arith.constant 0 : index
    %c0_16 = arith.constant 0 : index
    %23 = vector.load %arg7[%c0_15, %c0_16] : memref<1x128xf32, #tpu.memory_space<vmem>>, vector<1x128xf32>
    %24 = vector.broadcast %23 : vector<1x128xf32> to vector<16x128xf32>
    %25 = arith.addf %22, %24 : vector<16x128xf32>
    %cst_17 = arith.constant 0.000000e+00 : f32
    %26 = vector.broadcast %cst_17 : f32 to vector<16x128xf32>
    %27 = arith.maximumf %25, %26 : vector<16x128xf32>
    %c0_18 = arith.constant 0 : index
    %c0_19 = arith.constant 0 : index
    %28 = vector.load %arg11[%c0_18, %c0_19] : memref<16x128xf32, #tpu.memory_space<vmem>>, vector<16x128xf32>
    tpu.vector_store %arg11[%c0_18, %c0_19], %27 {strides = array<i32>} : memref<16x128xf32, #tpu.memory_space<vmem>>, vector<16x128xf32>,
    %c0_20 = arith.constant 0 : index
    %c0_21 = arith.constant 0 : index
    %29 = vector.load %arg8[%c0_20, %c0_21] : memref<1x256xf32, #tpu.memory_space<vmem>>, vector<1x256xf32>
    %30 = vector.broadcast %29 : vector<1x256xf32> to vector<16x256xf32>
    %31 = arith.mulf %19, %30 : vector<16x256xf32>
    %cst_22 = arith.constant dense<0.000000e+00> : vector<16xf32>
    %32 = vector.multi_reduction <add>, %31, %cst_22 [1] : vector<16x256xf32> to vector<16xf32>
    %33 = vector.shape_cast %32 : vector<16xf32> to vector<16x1xf32>
    %c0_23 = arith.constant 0 : index
    %c0_24 = arith.constant 0 : index
    %34 = memref.load %arg9[%c0_23, %c0_24] : memref<1x1xf32, #tpu.memory_space<smem>>
    %35 = vector.broadcast %34 : f32 to vector<16x1xf32>
    %36 = arith.addf %33, %35 : vector<16x1xf32>
    %c0_25 = arith.constant 0 : index
    %c0_26 = arith.constant 0 : index
    %37 = vector.load %arg10[%c0_25, %c0_26] : memref<16x1xf32, #tpu.memory_space<vmem>>, vector<16x1xf32>
    tpu.vector_store %arg10[%c0_25, %c0_26], %36 {strides = array<i32>} : memref<16x1xf32, #tpu.memory_space<vmem>>, vector<16x1xf32>,
    return
  }
  func.func @transform_0(%arg0: i32) -> (i32, i32) {
    %c0_i32 = arith.constant 0 : i32
    %c0_i32_0 = arith.constant 0 : i32
    return %arg0, %c0_i32 : i32, i32
  }
  func.func @transform_1(%arg0: i32) -> (i32, i32) {
    %c0_i32 = arith.constant 0 : i32
    %c0_i32_0 = arith.constant 0 : i32
    return %arg0, %c0_i32 : i32, i32
  }
  func.func @transform_2(%arg0: i32) -> (i32, i32) {
    %c0_i32 = arith.constant 0 : i32
    %c0_i32_0 = arith.constant 0 : i32
    return %arg0, %c0_i32 : i32, i32
  }
  func.func @transform_3(%arg0: i32) -> (i32, i32) {
    %c0_i32 = arith.constant 0 : i32
    %c0_i32_0 = arith.constant 0 : i32
    %c0_i32_1 = arith.constant 0 : i32
    return %c0_i32, %c0_i32_0 : i32, i32
  }
  func.func @transform_4(%arg0: i32) -> (i32, i32) {
    %c0_i32 = arith.constant 0 : i32
    %c0_i32_0 = arith.constant 0 : i32
    %c0_i32_1 = arith.constant 0 : i32
    return %c0_i32, %c0_i32_0 : i32, i32
  }
  func.func @transform_5(%arg0: i32) -> (i32, i32) {
    %c0_i32 = arith.constant 0 : i32
    %c0_i32_0 = arith.constant 0 : i32
    %c0_i32_1 = arith.constant 0 : i32
    return %c0_i32, %c0_i32_0 : i32, i32
  }
  func.func @transform_6(%arg0: i32) -> (i32, i32) {
    %c0_i32 = arith.constant 0 : i32
    %c0_i32_0 = arith.constant 0 : i32
    %c0_i32_1 = arith.constant 0 : i32
    return %c0_i32, %c0_i32_0 : i32, i32
  }
  func.func @transform_7(%arg0: i32) -> (i32, i32) {
    %c0_i32 = arith.constant 0 : i32
    %c0_i32_0 = arith.constant 0 : i32
    %c0_i32_1 = arith.constant 0 : i32
    return %c0_i32, %c0_i32_0 : i32, i32
  }
  func.func @transform_8(%arg0: i32) -> (i32, i32) {
    %c0_i32 = arith.constant 0 : i32
    %c0_i32_0 = arith.constant 0 : i32
    %c0_i32_1 = arith.constant 0 : i32
    return %c0_i32, %c0_i32_0 : i32, i32
  }
  func.func @transform_9(%arg0: i32) -> (i32, i32) {
    %c0_i32 = arith.constant 0 : i32
    %c0_i32_0 = arith.constant 0 : i32
    return %arg0, %c0_i32 : i32, i32
  }
  func.func @transform_10(%arg0: i32) -> (i32, i32) {
    %c0_i32 = arith.constant 0 : i32
    %c0_i32_0 = arith.constant 0 : i32
    return %arg0, %c0_i32 : i32, i32
  }
}

</mosaic_0001>

<bundles_post_ra>
// kernel: tpu_custom_call.1
= control target key start
LH: loop header
LB: loop body
LE: loop exit
PB: predicated region body
PF: predicated region fallthrough
CT: control target
= control target key end

     0   :  { %17 = vsyncpa [#allocation4], 0  ;;  %s1138_s0 = inlined_call_operand.hbm [shape: f32[16,128], index: 0, kind: input, shape index: {}]   ;;  %s1139_s1 = inlined_call_operand.hbm [shape: f32[16,128], index: 1, kind: input, shape index: {}]   ;;  %s1140_s2 = inlined_call_operand.hbm [shape: f32[16,128], index: 2, kind: input, shape index: {}]   ;;  %s1141_s3 = inlined_call_operand.hbm [shape: bf16[128,256], index: 3, kind: input, shape index: {}]   ;;  %s1142_s4 = inlined_call_operand.hbm [shape: f32[1,256], index: 4, kind: input, shape index: {}]   ;;  %s1143_s5 = inlined_call_operand.hbm [shape: bf16[256,128], index: 5, kind: input, shape index: {}]   ;;  %s1144_s6 = inlined_call_operand.hbm [shape: f32[1,128], index: 6, kind: input, shape index: {}]   ;;  %s1145_s7 = inlined_call_operand.hbm [shape: f32[1,256], index: 7, kind: input, shape index: {}]   ;;  %s1146_s8 = inlined_call_operand.<no memory space> [shape: f32[1,1], index: 8, kind: input, shape index: {}]   ;;  %s1147_s9 = inlined_call_operand.hbm [shape: f32[16,1], index: 9, kind: output, shape index: {0}]   ;;  %s1148_s10 = inlined_call_operand.hbm [shape: f32[16,128], index: 10, kind: output, shape index: {1}]  }
   0x1   :  { %18 = vsyncpa [#allocation7], 0 }
   0x2   :  { %19 = vsyncpa [#allocation10], 0 }
   0x3   :  { %20 = vsyncpa [#allocation13], 0 }
   0x4   :  { %21 = vsyncpa [#allocation16], 0 }
   0x5   :  { %22 = vsyncpa [#allocation5], 0 }
   0x6   :  { %23 = vsyncpa [#allocation19], 0  ;;  %s918_s13 = smov [#allocation6]   ;;  %s919_s15 = smov [#allocation9]  }
   0x7   :  { %s41_s14 = sshll.u32 %s918_s13, 4  ;;  %s65_s16 = sshll.u32 %s919_s15, 4  ;;  %s42_s14 = int_to_ptr.vmem [resolvable:$true] %s41_s14  ;;  %s988_s16 = int_to_ptr.vmem [resolvable:$true] %s65_s16 }
   0x8   :  { %s684_s19 = scalar_lea.hbm %s1139_s1, 256 }
   0x9   :  { %p685_p0 = scmp.ne.s32.totalorder %s1139_s1, %s684_s19  ;;  %p688_p1 = scmp.lt.u32.totalorder %s684_s19, %s1139_s1 }
   0xb   :  { %p690_p2 = pnand %p688_p1, %p685_p0 }
   0xd   :  { %693 = shalt.err (!%p690_p2)
}
   0xe   :  { %s694_s24 = scalar_lea.vmem %s42_s14, 256  ;;  %p699_p4 = scmp.lt.s32.totalorder %s42_s14, %s42_s14 }
   0xf   :  { %p695_p3 = scmp.ne.s32.totalorder %s42_s14, %s694_s24  ;;  %p700_p5 = scmp.lt.s32.totalorder %s694_s24, %s694_s24 }
  0x11   :  { %p701_p6 = por %p700_p5, %p699_p4 }
  0x13   :  { %p702_p7 = pnand %p701_p6, %p695_p3 }
  0x15   :  { %705 = shalt.err (!%p702_p7)
}
  0x16   :  { %s920_s25 = smov 128   ;;  %s921_s26 = smov 8  }
  0x17   :  { %47 = dma.hbm_to_vmem [thread:$0]  %s1139_s1, 256, %s42_s14, [#allocation7], %s920_s25, %s920_s25, %s921_s26  }
  0x18   :  { %s706_s11 = scalar_lea.hbm %s1141_s3, 2048 }
  0x19   :  { %p707_p8 = scmp.ne.s32.totalorder %s1141_s3, %s706_s11  ;;  %p710_p9 = scmp.lt.u32.totalorder %s706_s11, %s1141_s3 }
  0x1b   :  { %p712_p10 = pnand %p710_p9, %p707_p8 }
  0x1d   :  { %715 = shalt.err (!%p712_p10)
}
  0x1e   :  { %s716_s18 = scalar_lea.vmem %s988_s16, 2048  ;;  %p721_p12 = scmp.lt.s32.totalorder %s988_s16, %s988_s16 }
  0x1f   :  { %p717_p11 = scmp.ne.s32.totalorder %s988_s16, %s716_s18  ;;  %p722_p13 = scmp.lt.s32.totalorder %s716_s18, %s716_s18 }
  0x21   :  { %p723_p0 = por %p722_p13, %p721_p12 }
  0x23   :  { %p724_p1 = pnand %p723_p0, %p717_p11 }
  0x25   :  { %727 = shalt.err (!%p724_p1)
}
  0x26   :  { %71 = dma.hbm_to_vmem [thread:$0]  %s1141_s3, 2048, %s988_s16, [#allocation10], %s920_s25, %s920_s25, %s921_s26  }
  0x27   :  { %s922_s19 = smov [#allocation12]   ;;  %s728_s23 = scalar_lea.hbm %s1143_s5, 2048 }
  0x28   :  { %s87_s20 = sshll.u32 %s922_s19, 4  ;;  %p729_p2 = scmp.ne.s32.totalorder %s1143_s5, %s728_s23  ;;  %s88_s20 = int_to_ptr.vmem [resolvable:$true] %s87_s20 }
  0x29   :  { %p732_p3 = scmp.lt.u32.totalorder %s728_s23, %s1143_s5 }
  0x2b   :  { %p734_p4 = pnand %p732_p3, %p729_p2 }
  0x2d   :  { %737 = shalt.err (!%p734_p4)
}
  0x2e   :  { %s738_s30 = scalar_lea.vmem %s88_s20, 2048  ;;  %p743_p6 = scmp.lt.s32.totalorder %s88_s20, %s88_s20 }
  0x2f   :  { %p739_p5 = scmp.ne.s32.totalorder %s88_s20, %s738_s30  ;;  %p744_p7 = scmp.lt.s32.totalorder %s738_s30, %s738_s30 }
  0x31   :  { %p745_p8 = por %p744_p7, %p743_p6 }
  0x33   :  { %p746_p9 = pnand %p745_p8, %p739_p5 }
  0x35   :  { %749 = shalt.err (!%p746_p9)
}
  0x36   :  { %s923_s3 = smov 64   ;;  %s924_s16 = smov 4  }
  0x37   :  { %93 = dma.hbm_to_vmem [thread:$0]  %s1143_s5, 2048, %s88_s20, [#allocation13], %s923_s3, %s923_s3, %s924_s16  }
  0x38   :  { %s925_s13 = smov [#allocation3]   ;;  %s926_s17 = smov [#allocation8]  }
  0x39   :  { %s29_s15 = sshll.u32 %s925_s13, 4  ;;  %s53_s18 = sshll.u32 %s926_s17, 4  ;;  %s30_s15 = int_to_ptr.vmem [resolvable:$true] %s29_s15  ;;  %s54_s18 = int_to_ptr.vmem [resolvable:$true] %s53_s18 }
  0x3a   :  { %s750_s19 = scalar_lea.hbm %s1138_s0, 256 }
  0x3b   :  { %p751_p10 = scmp.ne.s32.totalorder %s1138_s0, %s750_s19  ;;  %p754_p11 = scmp.lt.u32.totalorder %s750_s19, %s1138_s0 }
  0x3d   :  { %p756_p12 = pnand %p754_p11, %p751_p10 }
  0x3f   :  { %759 = shalt.err (!%p756_p12)
}
  0x40   :  { %s760_s5 = scalar_lea.vmem %s30_s15, 256  ;;  %p765_p0 = scmp.lt.s32.totalorder %s30_s15, %s30_s15 }
  0x41   :  { %p761_p13 = scmp.ne.s32.totalorder %s30_s15, %s760_s5  ;;  %p766_p1 = scmp.lt.s32.totalorder %s760_s5, %s760_s5 }
  0x43   :  { %p767_p2 = por %p766_p1, %p765_p0 }
  0x45   :  { %p768_p3 = pnand %p767_p2, %p761_p13 }
  0x47   :  { %771 = shalt.err (!%p768_p3)
}
  0x48   :  { %35 = dma.hbm_to_vmem [thread:$0]  %s1138_s0, 256, %s30_s15, [#allocation4], %s920_s25, %s920_s25, %s921_s26  }
  0x49   :  { %s772_s30 = scalar_lea.hbm %s1140_s2, 256 }
  0x4a   :  { %p773_p4 = scmp.ne.s32.totalorder %s1140_s2, %s772_s30  ;;  %p776_p5 = scmp.lt.u32.totalorder %s772_s30, %s1140_s2 }
  0x4c   :  { %p778_p6 = pnand %p776_p5, %p773_p4 }
  0x4e   :  { %781 = shalt.err (!%p778_p6)
}
  0x4f   :  { %s782_s13 = scalar_lea.vmem %s54_s18, 256  ;;  %p787_p8 = scmp.lt.s32.totalorder %s54_s18, %s54_s18 }
  0x50   :  { %p783_p7 = scmp.ne.s32.totalorder %s54_s18, %s782_s13  ;;  %p788_p9 = scmp.lt.s32.totalorder %s782_s13, %s782_s13 }
  0x52   :  { %p789_p10 = por %p788_p9, %p787_p8 }
  0x54   :  { %p790_p11 = pnand %p789_p10, %p783_p7 }
  0x56   :  { %793 = shalt.err (!%p790_p11)
}
  0x57   :  { %59 = dma.hbm_to_vmem [thread:$0]  %s1140_s2, 256, %s54_s18, [#allocation7], %s920_s25, %s920_s25, %s921_s26  }
  0x58   :  { %s927_s17 = smov [#allocation11]   ;;  %s928_s14 = smov [#allocation14]  }
  0x59   :  { %s78_s1 = sshll.u32 %s927_s17, 4  ;;  %s100_s19 = sshll.u32 %s928_s14, 4  ;;  %s79_s1 = int_to_ptr.vmem [resolvable:$true] %s78_s1  ;;  %s101_s19 = int_to_ptr.vmem [resolvable:$true] %s100_s19 }
  0x5a   :  { %s794_s23 = scalar_lea.hbm %s1142_s4, 32 }
  0x5b   :  { %p795_p12 = scmp.ne.s32.totalorder %s1142_s4, %s794_s23  ;;  %p798_p13 = scmp.lt.u32.totalorder %s794_s23, %s1142_s4 }
  0x5d   :  { %p800_p0 = pnand %p798_p13, %p795_p12 }
  0x5f   :  { %803 = shalt.err (!%p800_p0)
}
  0x60   :  { %s804_s2 = scalar_lea.vmem %s79_s1, 32  ;;  %p809_p2 = scmp.lt.s32.totalorder %s79_s1, %s79_s1 }
  0x61   :  { %p805_p1 = scmp.ne.s32.totalorder %s79_s1, %s804_s2  ;;  %p810_p3 = scmp.lt.s32.totalorder %s804_s2, %s804_s2 }
  0x63   :  { %p811_p4 = por %p810_p3, %p809_p2 }
  0x65   :  { %p812_p5 = pnand %p811_p4, %p805_p1 }
  0x67   :  { %815 = shalt.err (!%p812_p5)
}
  0x68   :  { %81 = dma.hbm_to_vmem [thread:$0]  %s1142_s4, 32, %s79_s1, [#allocation10]  }
  0x69   :  { %s816_s3 = scalar_lea.hbm %s1144_s6, 16 }
  0x6a   :  { %p817_p6 = scmp.ne.s32.totalorder %s1144_s6, %s816_s3  ;;  %p820_p7 = scmp.lt.u32.totalorder %s816_s3, %s1144_s6 }
  0x6c   :  { %p822_p8 = pnand %p820_p7, %p817_p6 }
  0x6e   :  { %825 = shalt.err (!%p822_p8)
}
  0x6f   :  { %s826_s0 = scalar_lea.vmem %s101_s19, 16  ;;  %s830_s15 = scalar_lea.vmem %s101_s19, 32 }
  0x70   :  { %p827_p9 = scmp.ne.s32.totalorder %s101_s19, %s826_s0  ;;  %p831_p10 = scmp.lt.s32.totalorder %s101_s19, %s101_s19 }
  0x71   :  { %p832_p11 = scmp.lt.s32.totalorder %s830_s15, %s826_s0 }
  0x73   :  { %p833_p12 = por %p832_p11, %p831_p10 }
  0x75   :  { %p834_p13 = pnand %p833_p12, %p827_p9 }
  0x77   :  { %837 = shalt.err (!%p834_p13)
}
  0x78   :  { %103 = dma.hbm_to_vmem [thread:$0]  %s1144_s6, 16, %s101_s19, [#allocation13]  }
  0x79   :  { %s929_s1 = smov [#allocation15]   ;;  %s838_s23 = scalar_lea.hbm %s1145_s7, 32 }
  0x7a   :  { %s110_s14 = sshll.u32 %s929_s1, 4  ;;  %p839_p0 = scmp.ne.s32.totalorder %s1145_s7, %s838_s23  ;;  %s111_s14 = int_to_ptr.vmem [resolvable:$true] %s110_s14 }
  0x7b   :  { %p842_p1 = scmp.lt.u32.totalorder %s838_s23, %s1145_s7 }
  0x7d   :  { %p844_p2 = pnand %p842_p1, %p839_p0 }
  0x7f   :  { %847 = shalt.err (!%p844_p2)
}
  0x80   :  { %s848_s2 = scalar_lea.vmem %s111_s14, 32  ;;  %p853_p4 = scmp.lt.s32.totalorder %s111_s14, %s111_s14 }
  0x81   :  { %p849_p3 = scmp.ne.s32.totalorder %s111_s14, %s848_s2  ;;  %p854_p5 = scmp.lt.s32.totalorder %s848_s2, %s848_s2 }
  0x83   :  { %p855_p6 = por %p854_p5, %p853_p4 }
  0x85   :  { %p856_p7 = pnand %p855_p6, %p849_p3 }
  0x87   :  { %859 = shalt.err (!%p856_p7)
}
  0x88   :  { %113 = dma.hbm_to_vmem [thread:$0]  %s1145_s7, 32, %s111_s14, [#allocation16]  }
  0x89   :  { %904 = dma.done.wait [#allocation4], 256  }
  0x8a   :  { %905 = vsyncadd [#allocation4], 4294967040 }
  0x8b   :  { %906 = dma.done.wait [#allocation7], 512  }
  0x8c   :  { %907 = vsyncadd [#allocation7], 4294966784 }
  0x8d   :  { %908 = dma.done.wait [#allocation10], 2080  }
  0x8e   :  { %909 = vsyncadd [#allocation10], 4294965216 }
  0x8f   :  { %910 = dma.done.wait [#allocation13], 2064  }
  0x90   :  { %911 = vsyncadd [#allocation13], 4294965232 }
  0x91   :  { %912 = dma.done.wait [#allocation16], 32  }
  0x92   :  { %913 = vsyncadd [#allocation16], 4294967264  ;;  %v930_v0 = vmov 0   ;;  %v644_v1 = vld [vmem:[#allocation9 + $0x4] ss:$8 sps:$4 sm:$0xff]   ;;  %v672_v20 = vld [vmem:[#allocation12 + $0x50] sm:$0xff]   ;;  %v175_v49 = vlaneseq }
  0x93   :  { %297 = vmatprep.mubr.bf16.mxu0 %v930_v0  ;;  %v646_v2 = vld [vmem:[#allocation9] ss:$8 sps:$4 sm:$0xff]   ;;  %265 = vmatprep.subr.bf16.mxu0 %v644_v1  ;;  %v647_v3 = vld [vmem:[#allocation9 + $0x14] ss:$8 sps:$4 sm:$0xff]   ;;  %v649_v4 = vld [vmem:[#allocation9 + $0x10] ss:$8 sps:$4 sm:$0xff]  }
  0x94   :  { %266 = vmatpush1.bf16.msra.mxu0 %v646_v2  ;;  %v650_v5 = vld [vmem:[#allocation9 + $0x24] ss:$8 sps:$4 sm:$0xff]   ;;  %v652_v6 = vld [vmem:[#allocation9 + $0x20] ss:$8 sps:$4 sm:$0xff]   ;;  %v653_v7 = vld [vmem:[#allocation9 + $0x34] ss:$8 sps:$4 sm:$0xff]  }
  0x95   :  { %267 = vmatprep.subr.bf16.mxu0 %v647_v3  ;;  %v655_v8 = vld [vmem:[#allocation9 + $0x30] ss:$8 sps:$4 sm:$0xff]   ;;  %v656_v9 = vld [vmem:[#allocation9 + $0x44] ss:$8 sps:$4 sm:$0xff]   ;;  %v658_v10 = vld [vmem:[#allocation9 + $0x40] ss:$8 sps:$4 sm:$0xff]  }
  0x96   :  { %v668_v11 = vld [vmem:[#allocation12 + $0x40] sm:$0xff]   ;;  %v659_v12 = vld [vmem:[#allocation9 + $0x54] ss:$8 sps:$4 sm:$0xff]   ;;  %v670_v15 = vld [vmem:[#allocation12 + $0x48] sm:$0xff]   ;;  %v176_v50 = vshrl.u32 %v175_v49, 7  ;;  %vm534_vm0 = vcmask 7168  }
  0x97   :  { %v669_v13 = vld [vmem:[#allocation12] sm:$0xff]   ;;  %607 = vmatprep.subr.bf16.mxu1 %v668_v11  ;;  %v661_v16 = vld [vmem:[#allocation9 + $0x50] ss:$8 sps:$4 sm:$0xff]   ;;  %v665_v26 = vld [vmem:[#allocation9 + $0x74] ss:$8 sps:$4 sm:$0xff]   ;;  %s931_s28 = smov [#allocation17]  }
  0x98   :  { %268 = vmatpush1.bf16.msra.mxu0 %v649_v4  ;;  %v143_v14 = vld [vmem:[#allocation6] sm:$0xff]  ;;  %608 = vmatpush3.bf16.msra.mxu1 %v669_v13  ;;  %v144_v17 = vld [vmem:[#allocation6 + $0x8] sm:$0xff]  ;;  %v673_v22 = vld [vmem:[#allocation12 + $0x10] sm:$0xff]   ;;  %v177_v51 = vsub.s32 0, %v176_v50  ;;  %v181_v53 = vsub.s32 1, %v176_v50  ;;  %s542_s29 = sshll.u32 %s931_s28, 4  ;;  %s543_s29 = int_to_ptr.vmem [resolvable:$true] %s542_s29 }
  0x99   :  { %269 = vmatprep.subr.bf16.mxu0 %v650_v5  ;;  %v671_v18 = vld [vmem:[#allocation12 + $0x8] sm:$0xff]   ;;  %609 = vmatprep.subr.bf16.mxu1 %v670_v15  ;;  %v145_v21 = vmul.f32 0.1, %v143_v14  ;;  %v674_v25 = vld [vmem:[#allocation12 + $0x58] sm:$0xff]   ;;  %v146_v27 = vmul.f32 0.1, %v144_v17  ;;  %p865_p9 = scmp.lt.s32.totalorder %s543_s29, %s543_s29 }
  0x9a   :  { %v662_v19 = vld [vmem:[#allocation9 + $0x64] ss:$8 sps:$4 sm:$0xff]   ;;  %v664_v23 = vld [vmem:[#allocation9 + $0x60] ss:$8 sps:$4 sm:$0xff]   ;;  %v141_v24 = vld [vmem:[#allocation3] sm:$0xff]  ;;  %s860_s30 = scalar_lea.vmem %s543_s29, 256 }
  0x9b   :  { %v142_v28 = vld [vmem:[#allocation3 + $0x8] sm:$0xff]  ;;  %v676_v30 = vld [vmem:[#allocation12 + $0x60] sm:$0xff]   ;;  %v149_v32 = vld [vmem:[#allocation8] sm:$0xff]  ;;  %v147_v34 = vadd.f32 %v145_v21, %v141_v24  ;;  %p861_p8 = scmp.ne.s32.totalorder %s543_s29, %s860_s30  ;;  %p866_p10 = scmp.lt.s32.totalorder %s860_s30, %s860_s30 }
  0x9c   :  { %270 = vmatpush1.bf16.msra.mxu0 %v652_v6  ;;  %610 = vmatpush3.bf16.msra.mxu1 %v671_v18  ;;  %v675_v29 = vld [vmem:[#allocation12 + $0x18] sm:$0xff]   ;;  %v148_v35 = vadd.f32 %v146_v27, %v142_v28  ;;  %v677_v36 = vld [vmem:[#allocation12 + $0x20] sm:$0xff]   ;;  %v678_v37 = vld [vmem:[#allocation12 + $0x68] sm:$0xff]   ;;  %v151_v39 = vmul.f32 %v149_v32, %v141_v24  ;;  %v531_v27 = vstv %s1146_s8 }
  0x9d   :  { %271 = vmatprep.subr.bf16.mxu0 %v653_v7  ;;  %611 = vmatprep.subr.bf16.mxu1 %v672_v20  ;;  %v667_v31 = vld [vmem:[#allocation9 + $0x70] ss:$8 sps:$4 sm:$0xff]   ;;  %v173_v52 = vld [vmem:[#allocation11] sm:$0x3]  ;;  %v508_v4 = vld [vmem:[#allocation15] sm:$0x3]  ;;  %p867_p11 = por %p866_p10, %p865_p9 }
  0x9e   :  { %v150_v33 = vld [vmem:[#allocation8 + $0x8] sm:$0xff]  ;;  %v155_v38 = vpack.c.bf16 %v148_v35, %v147_v34  ;;  %v153_v41 = vmul.f32 2.0, %v151_v39  ;;  %v679_v44 = vld [vmem:[#allocation12 + $0x28] sm:$0xff]   ;;  %v178_v54 = vrot.slane %v173_v52, %v177_v51  ;;  %v182_v55 = vrot.slane %v173_v52, %v181_v53 }
  0x9f   :  { %v152_v40 = vmul.f32 %v150_v33, %v142_v28  ;;  %v680_v45 = vld [vmem:[#allocation12 + $0x70] sm:$0xff]   ;;  %v682_v47 = vld [vmem:[#allocation12 + $0x78] sm:$0xff]   ;;  %v517_v13 = vrot.slane %v508_v4, %v181_v53  ;;  %p868_p12 = pnand %p867_p11, %p861_p8 }
  0xa0   :  { %272 = vmatpush1.bf16.msra.mxu0 %v655_v8  ;;  %612 = vmatpush3.bf16.msra.mxu1 %v673_v22  ;;  %v681_v46 = vld [vmem:[#allocation12 + $0x30] sm:$0xff]   ;;  %v683_v48 = vld [vmem:[#allocation12 + $0x38] sm:$0xff]  }
  0xa1   :  { %273 = vmatprep.subr.bf16.mxu0 %v656_v9  ;;  %613 = vmatprep.subr.bf16.mxu1 %v674_v25  ;;  %v154_v42 = vmul.f32 2.0, %v152_v40 }
  0xa3   :  { %v156_v43 = vpack.c.bf16 %v154_v42, %v153_v41 }
  0xa4   :  { %274 = vmatpush1.bf16.msra.mxu0 %v658_v10  ;;  %614 = vmatpush3.bf16.msra.mxu1 %v675_v29  ;;  %v513_v10 = vrot.slane %v508_v4, %v177_v51 }
  0xa5   :  { %275 = vmatprep.subr.bf16.mxu0 %v659_v12  ;;  %615 = vmatprep.subr.bf16.mxu1 %v676_v30 }
  0xa8   :  { %276 = vmatpush1.bf16.msra.mxu0 %v661_v16  ;;  %616 = vmatpush3.bf16.msra.mxu1 %v677_v36 }
  0xa9   :  { %277 = vmatprep.subr.bf16.mxu0 %v662_v19  ;;  %617 = vmatprep.subr.bf16.mxu1 %v678_v37 }
  0xac   :  { %278 = vmatpush1.bf16.msra.mxu0 %v664_v23  ;;  %618 = vmatpush3.bf16.msra.mxu1 %v679_v44 }
  0xad   :  { %279 = vmatprep.subr.bf16.mxu0 %v665_v26  ;;  %619 = vmatprep.subr.bf16.mxu1 %v680_v45 }
  0xb0   :  { %280 = vmatpush1.bf16.msra.mxu0 %v667_v31  ;;  %620 = vmatpush3.bf16.msra.mxu1 %v681_v46 }
  0xb1   :  { %621 = vmatprep.subr.bf16.mxu1 %v682_v47 }
  0xb3   :  { %298 = vmatmul.mubr.bf16.vlgmr.msra.gmra.mrb[0].mxu0 %v155_v38 }
  0xb4   :  { %307 = vmatprep.mubr.bf16.mxu0 %v930_v0  ;;  %622 = vmatpush3.bf16.msra.mxu1 %v683_v48 }
  0xbb   :  { %308 = vmatmul.mubr.bf16.gmra.mrb[4].mxu0 %v156_v43 }
 0x186   :  { %v299_v56 = vpop.f32.mrb[0].mxu0 }
 0x187   :  { %v300_v57 = vadd.f32 %v299_v56, %v178_v54  ;;  %v301_v58 = vpop.f32.mrb[1].mxu0 }
 0x188   :  { %v302_v59 = vadd.f32 %v301_v58, %v182_v55  ;;  %v303_v60 = vpop.f32.mrb[2].mxu0 }
 0x189   :  { %v304_v61 = vadd.f32 %v303_v60, %v178_v54  ;;  %v305_v62 = vpop.f32.mrb[3].mxu0  ;;  %v318_v0 = vmax.f32 %v300_v57, 0.0 }
 0x18a   :  { %v306_v63 = vadd.f32 %v305_v62, %v182_v55  ;;  %v319_v2 = vmax.f32 %v302_v59, 0.0 }
 0x18b   :  { %v320_v1 = vmax.f32 %v304_v61, 0.0 }
 0x18c   :  { %v321_v3 = vmax.f32 %v306_v63, 0.0 }
 0x18d   :  { %v326_v5 = vpack.c.bf16 %v320_v1, %v318_v0 }
 0x18e   :  { %v327_v6 = vpack.c.bf16 %v321_v3, %v319_v2  ;;  %v309_v7 = vpop.f32.mrb[4].mxu0 }
 0x18f   :  { %v310_v8 = vadd.f32 %v309_v7, %v178_v54  ;;  %v311_v9 = vpop.f32.mrb[5].mxu0 }
 0x190   :  { %495 = vmatprep.mubr.bf16.mxu1 %v327_v6  ;;  %v312_v11 = vadd.f32 %v311_v9, %v182_v55  ;;  %v313_v12 = vpop.f32.mrb[6].mxu0 }
 0x191   :  { %496 = vmatmul.mubr.bf16.vlgmr.msra.gmra.mrb[0].mxu1 %v326_v5  ;;  %v322_v14 = vmax.f32 %v310_v8, 0.0  ;;  %v314_v15 = vadd.f32 %v313_v12, %v178_v54  ;;  %v315_v16 = vpop.f32.mrb[7].mxu0 }
 0x192   :  { %v323_v17 = vmax.f32 %v312_v11, 0.0  ;;  %v316_v18 = vadd.f32 %v315_v16, %v182_v55 }
 0x193   :  { %v324_v19 = vmax.f32 %v314_v15, 0.0  ;;  %v520_v20 = vmul.f32 %v513_v10, %v322_v14 }
 0x194   :  { %v325_v21 = vmax.f32 %v316_v18, 0.0  ;;  %v521_v22 = vmul.f32 %v517_v13, %v323_v17 }
 0x195   :  { %v522_v23 = vmul.f32 %v513_v10, %v324_v19 }
 0x196   :  { %v523_v24 = vmul.f32 %v517_v13, %v325_v21  ;;  %v524_v25 = vadd.f32 %v521_v22, %v520_v20 }
 0x198   :  { %525 = vadd.xlane.f32.xlu0 %v524_v25  ;;  %v527_v26 = vadd.f32 %v523_v24, %v522_v23 }
 0x19c   :  { %528 = vadd.xlane.f32.xlu0 %v527_v26 }
 0x225   :  { %v526_v28 = vpop.xlane.xlu0 %525 }
 0x226   :  { %v532_v29 = vadd.f32 %v531_v27, %v526_v28 }
 0x228   :  { %535 = vst.msk [vmem:[#allocation17] sm:$0xff] %vm534_vm0, %v532_v29 }
 0x229   :  { %v529_v30 = vpop.xlane.xlu0 %528 }
 0x22a   :  { %v533_v31 = vadd.f32 %v531_v27, %v529_v30 }
 0x22c   :  { %536 = vst.msk [vmem:[#allocation17 + $0x8] sm:$0xff] %vm534_vm0, %v533_v31 }
 0x22d   :  { %871 = shalt.err (!%p868_p12)
}
 0x22e   :  { %s872_s8 = scalar_lea.hbm %s1147_s9, 256 }
 0x22f   :  { %p873_p13 = scmp.ne.s32.totalorder %s1147_s9, %s872_s8  ;;  %p876_p0 = scmp.lt.u32.totalorder %s872_s8, %s1147_s9 }
 0x231   :  { %p878_p1 = pnand %p876_p0, %p873_p13 }
 0x233   :  { %881 = shalt.err (!%p878_p1)
}
 0x234   :  { %548 = dma.vmem_to_hbm [thread:$0]  %s543_s29, 256, %s1147_s9, [#allocation5], %s920_s25, %s920_s25, %s921_s26   ;;  %v590_v33 = vld [vmem:[#allocation14] ss:$0 sm:$0xff] }
 0x235   :  { %s932_s17 = smov [#allocation18]  }
 0x236   :  { %s554_s1 = sshll.u32 %s932_s17, 4  ;;  %s555_s1 = int_to_ptr.vmem [resolvable:$true] %s554_s1 }
 0x237   :  { %s882_s14 = scalar_lea.vmem %s555_s1, 256  ;;  %p887_p3 = scmp.lt.s32.totalorder %s555_s1, %s555_s1 }
 0x238   :  { %p883_p2 = scmp.ne.s32.totalorder %s555_s1, %s882_s14  ;;  %p888_p4 = scmp.lt.s32.totalorder %s882_s14, %s882_s14 }
 0x23a   :  { %p889_p5 = por %p888_p4, %p887_p3 }
 0x23c   :  { %p890_p6 = pnand %p889_p5, %p883_p2 }
 0x264   :  { %v623_v32 = vpop.f32.mrb[0].mxu1 }
 0x265   :  { %v624_v34 = vpop.f32.mrb[1].mxu1 }
 0x266   :  { %v625_v35 = vadd.f32 %v624_v34, %v623_v32  ;;  %v626_v36 = vpop.f32.mrb[2].mxu1 }
 0x267   :  { %v627_v37 = vpop.f32.mrb[3].mxu1 }
 0x268   :  { %v498_v38 = vadd.f32 %v625_v35, %v590_v33  ;;  %v628_v39 = vadd.f32 %v627_v37, %v626_v36 }
 0x26a   :  { %v504_v40 = vmax.f32 %v498_v38, 0.0  ;;  %v501_v41 = vadd.f32 %v628_v39, %v590_v33 }
 0x26c   :  { %506 = vst [vmem:[#allocation18] sm:$0xff] %v504_v40  ;;  %v505_v42 = vmax.f32 %v501_v41, 0.0 }
 0x26e   :  { %507 = vst [vmem:[#allocation18 + $0x8] sm:$0xff] %v505_v42 }
 0x26f   :  { %893 = shalt.err (!%p890_p6)
}
 0x270   :  { %s894_s22 = scalar_lea.hbm %s1148_s10, 256 }
 0x271   :  { %p895_p7 = scmp.ne.s32.totalorder %s1148_s10, %s894_s22  ;;  %p898_p8 = scmp.lt.u32.totalorder %s894_s22, %s1148_s10 }
 0x273   :  { %p900_p9 = pnand %p898_p8, %p895_p7 }
 0x275   :  { %903 = shalt.err (!%p900_p9)
}
 0x276   :  { %560 = dma.vmem_to_hbm [thread:$0]  %s555_s1, 256, %s1148_s10, [#allocation19], %s920_s25, %s920_s25, %s921_s26  }
 0x277   :  { %914 = dma.done.wait [#allocation5], 256  }
 0x278   :  { %915 = vsyncadd [#allocation5], 4294967040 }
 0x279   :  { %916 = dma.done.wait [#allocation19], 256  }
 0x27a   :  { %917 = vsyncadd [#allocation19], 4294967040 }
 0x27b   :  { %567 = vsyncpa [#allocation4], 1 }
 0x27c   :  { %568 = vsyncpa [#allocation7], 1 }
 0x27d   :  { %569 = vsyncpa [#allocation10], 1 }
 0x27e   :  { %570 = vsyncpa [#allocation13], 1 }
 0x27f   :  { %571 = vsyncpa [#allocation16], 1 }
 0x280   :  { %572 = vsyncpa [#allocation5], 1 }
 0x281   :  { %573 = vsyncpa [#allocation19], 1 }

</bundles_post_ra>
